<compile_context>
chip_gen: v7x
topology: tpu7x:2x2x1
jax: 0.10.0
libtpu: 0.0.40
codegen_flags: <defaults>
</compile_context>

<pallas_src>
import math
import functools

import jax
import jax.numpy as jnp
from jax import lax
from jax.experimental import pallas as pl
from jax.experimental.pallas import tpu as pltpu


# ----------------------------------------------------------------------------
# Module-init style table: [max_len, 1, d_model] in the activation dtype.
# ----------------------------------------------------------------------------
def make_pe_table(d_model: int, max_len: int = 5000, dtype=jnp.float32):
    position = jnp.arange(0, max_len, dtype=jnp.float32)[:, None]             # [L, 1]
    div_term = jnp.exp(jnp.arange(0, d_model, 2, dtype=jnp.float32)
                       * (-math.log(10000.0) / d_model))                       # [D/2]
    pe = jnp.zeros((max_len, d_model), dtype=jnp.float32)
    pe = pe.at[:, 0::2].set(jnp.sin(position * div_term))
    pe = pe.at[:, 1::2].set(jnp.cos(position * div_term))
    # TODO(synk): pre-casting pe to bf16 here (to halve its HBM read) makes the
    # add slightly less precise than PyTorch's f32 pe + bf16 x path.
    return pe[:, None, :].astype(dtype)                                        # [L, 1, D]


# ----------------------------------------------------------------------------
# Kernels
# ----------------------------------------------------------------------------
def _pe_eval_kernel(x_ref, pe_ref, o_ref):
    # x_ref: [tS, tB, D], pe_ref: [tS, 1, D] -> broadcast add over batch.
    o_ref[...] = (x_ref[...] + pe_ref[...]).astype(o_ref.dtype)


def _shr_logical(h, k):
    # Logical right shift for int32 (jnp `>>` is arithmetic for signed ints):
    # arithmetic shift then mask off the smeared sign bits.
    return (h >> k) & ((1 << (32 - k)) - 1)


def _pe_dropout_kernel(seed_ref, x_ref, pe_ref, o_ref, *,
                       keep_threshold, scale, B, D):
    ts, tb, d = x_ref.shape
    i = pl.program_id(0)
    j = pl.program_id(1)

    y = x_ref[...] + pe_ref[...]

    # Globally unique per-element counter (partial-block garbage rows are
    # discarded by the masked writeback, so OOB indices are harmless).
    shp = (ts, tb, d)
    s_idx = lax.broadcasted_iota(jnp.int32, shp, 0) + i * ts
    b_idx = lax.broadcasted_iota(jnp.int32, shp, 1) + j * tb
    d_idx = lax.broadcasted_iota(jnp.int32, shp, 2)
    lin = (s_idx * B + b_idx) * D + d_idx

    # Mix the seed multiplicatively (golden-ratio constant) so nearby seeds /
    # tiles never share streams, then lowbias32-style avalanche.  Pure int32
    # VPU ops; multiplies wrap (two's complement), shifts are made logical.
    seed_mix = seed_ref[0] * jnp.int32(-1640531527) + jnp.int32(0x2545F491)
    h = lin ^ seed_mix
    h = h ^ _shr_logical(h, 16)
    h = h * jnp.int32(0x7FEB352D)
    h = h ^ _shr_logical(h, 15)
    h = h * jnp.int32(-2073514357)          # 0x846CA68B as int32
    h = h ^ _shr_logical(h, 16)

    # keep iff low 24 bits >= rate * 2^24  =>  P(keep) = 1 - rate.
    keep = (h & 0x00FFFFFF) >= keep_threshold
    # Inverted-dropout scale, kept in the activation dtype (no f32 round trip).
    o_ref[...] = jnp.where(keep, y * scale, 0.0).astype(o_ref.dtype)
    # TODO(synk): mask distribution matches nn.Dropout but the RNG stream is
    # not bit-identical to torch's.


# ----------------------------------------------------------------------------
# Tile selection: VMEM-padding aware, targets ~4 MiB blocks.
# ----------------------------------------------------------------------------
def _round_up(a, m):
    return ((a + m - 1) // m) * m


def _choose_tiles(S, B, D, itemsize, target_bytes=4 * 1024 * 1024):
    sub = {4: 8, 2: 16, 1: 32}.get(itemsize, 8)          # sublane pack per dtype
    d_pad = _round_up(D, 128)
    row_bytes = _round_up(B, sub) * d_pad * itemsize      # padded bytes per seq row

    if row_bytes <= target_bytes:
        tB = B
        tS = max(1, target_bytes // row_bytes)
        tS = min(int(tS), S)
        if tS >= 8:
            tS = (tS // 8) * 8
        # Guarantee >=2 grid steps when possible so both v7x TCs get work.
        if S > 1 and tS >= S:
            tS = pl.cdiv(S, 2)
    else:
        # One sequence row is already big: tile the batch axis instead.
        tS = 1
        per_sub = sub * d_pad * itemsize
        tB = max(1, target_bytes // per_sub) * sub
        tB = min(int(tB), B)
        if tB < B:
            tB = max(sub, (tB // sub) * sub)              # keep 8/16-divisible
    return int(tS), int(tB)


# ----------------------------------------------------------------------------
# Wrapper
# ----------------------------------------------------------------------------
def positional_encoding(x, pe_table, *, dropout_rate=0.1, training=False,
                        seed=0, block_rows=None, block_batch=None,
                        donate_x=False):
    """x: [S, B, D], pe_table: [max_len, 1, D]. Returns dropout(x + pe[:S])."""
    S, B, D = x.shape
    L = pe_table.shape[0]
    assert pe_table.shape == (L, 1, D) and L >= S, "pe_table must be [max_len,1,D]"
    if pe_table.dtype != x.dtype:
        pe_table = pe_table.astype(x.dtype)   # avoid by building table in x.dtype

    tS, tB = _choose_tiles(S, B, D, jnp.dtype(x.dtype).itemsize)
    if block_rows is not None:
        tS = max(1, min(int(block_rows), S))
    if block_batch is not None:
        tB = max(1, min(int(block_batch), B))

    grid = (pl.cdiv(S, tS), pl.cdiv(B, tB))
    out_shape = jax.ShapeDtypeStruct((S, B, D), x.dtype)
    cparams = pltpu.CompilerParams(
        dimension_semantics=("parallel", "parallel"),
        vmem_limit_bytes=48 * 1024 * 1024,
    )

    if (not training) or float(dropout_rate) == 0.0:
        return pl.pallas_call(
            _pe_eval_kernel,
            out_shape=out_shape,
            grid_spec=pltpu.PrefetchScalarGridSpec(
                num_scalar_prefetch=0,
                grid=grid,
                in_specs=[
                    pl.BlockSpec((tS, tB, D), lambda i, j: (i, j, 0)),
                    pl.BlockSpec((tS, 1, D), lambda i, j: (i, 0, 0)),
                ],
                out_specs=pl.BlockSpec((tS, tB, D), lambda i, j: (i, j, 0)),
            ),
            compiler_params=cparams,
            input_output_aliases=({0: 0} if donate_x else {}),
        )(x, pe_table)

    rate = float(dropout_rate)
    assert 0.0 <= rate < 1.0
    keep_threshold = int(round(rate * (1 << 24)))
    scale = 1.0 / (1.0 - rate)
    kernel = functools.partial(
        _pe_dropout_kernel, keep_threshold=keep_threshold, scale=scale, B=B, D=D)
    seed_arr = jnp.asarray(seed, dtype=jnp.int32).reshape((1,))
    return pl.pallas_call(
        kernel,
        out_shape=out_shape,
        grid_spec=pltpu.PrefetchScalarGridSpec(
            num_scalar_prefetch=1,                 # dropout seed lands in SMEM
            grid=grid,
            in_specs=[
                pl.BlockSpec((tS, tB, D), lambda i, j, s: (i, j, 0)),
                pl.BlockSpec((tS, 1, D), lambda i, j, s: (i, 0, 0)),
            ],
            out_specs=pl.BlockSpec((tS, tB, D), lambda i, j, s: (i, j, 0)),
        ),
        compiler_params=cparams,
        input_output_aliases=({1: 0} if donate_x else {}),
    )(seed_arr, x, pe_table)


# ----------------------------------------------------------------------------
# Self-test
# ----------------------------------------------------------------------------
if __name__ == "__main__":
    # [seq_len, batch, d_model]; d_model = 128 keeps stores lane-dense.
    S, B, D = 16, 4, 128
    MAX_LEN = 64   # small max_len for the synthetic table (module default is 5000)

    key = jax.random.PRNGKey(0)
    x = jax.random.normal(key, (S, B, D), dtype=jnp.float32)
    pe = make_pe_table(D, max_len=MAX_LEN)                 # [64, 1, 128] f32
    ref = x + pe[:S]

    # 1) Eval mode, auto tiles (>= 2 S-blocks -> both v7x TCs see work).
    out = jax.block_until_ready(positional_encoding(x, pe, training=False))
    assert out.shape == (S, B, D)
    assert jnp.allclose(out, ref, atol=1e-6), "eval-path mismatch vs reference"

    # 2) Eval mode, non-divisible tile (partial last block handled by Pallas).
    out_p = jax.block_until_ready(
        positional_encoding(x, pe, training=False, block_rows=5))
    assert jnp.allclose(out_p, ref, atol=1e-6), "partial-block mismatch"

    # 3) bf16 activations with a bf16 table built at "module init".
    pe_bf = make_pe_table(D, max_len=MAX_LEN, dtype=jnp.bfloat16)
    out_bf = jax.block_until_ready(
        positional_encoding(x.astype(jnp.bfloat16), pe_bf, training=False))
    assert out_bf.dtype == jnp.bfloat16
    assert jnp.allclose(out_bf.astype(jnp.float32), ref, atol=5e-2), "bf16 mismatch"

    # 4) Training mode: every element is 0 (dropped) or ref/(1-p), and the
    #    keep fraction is close to 1-p.
    rate = 0.1
    out_tr = jax.block_until_ready(
        positional_encoding(x, pe, dropout_rate=rate, training=True,
                            seed=123, block_rows=5))
    assert out_tr.shape == (S, B, D)
    err = jnp.minimum(jnp.abs(out_tr), jnp.abs(out_tr - ref / (1.0 - rate)))
    assert jnp.max(err) < 1e-4, "dropout-path values not in {0, y/(1-p)}"
    keep_frac = float(jnp.mean((out_tr != 0).astype(jnp.float32)))
    assert 0.82 < keep_frac < 0.97, f"dropout keep fraction off: {keep_frac}"

    print("KERNEL_OK")
</pallas_src>

<mosaic_0001>
module attributes {stable_mosaic.version = 11 : i64} {
  func.func @_pe_eval_kernel(%arg0: i32, %arg1: i32, %arg2: memref<8x4x128xf32, #tpu.memory_space<vmem>>, %arg3: memref<8x1x128xf32, #tpu.memory_space<vmem>>, %arg4: memref<8x4x128xf32, #tpu.memory_space<vmem>>) attributes {dimension_semantics = [#tpu.dimension_semantics<parallel>, #tpu.dimension_semantics<parallel>], iteration_bounds = array<i64: 2, 1>, scalar_prefetch = 0 : i64, scratch_operands = 0 : i64, tpu.core_type = #tpu.core_type<tc>, window_params = [{transform_indices = @transform_0, window_bounds = array<i64: 8, 4, 128>}, {transform_indices = @transform_1, window_bounds = array<i64: 8, 1, 128>}, {transform_indices = @transform_2, window_bounds = array<i64: 8, 4, 128>}]} {
    %c0 = arith.constant 0 : index
    %c0_0 = arith.constant 0 : index
    %c0_1 = arith.constant 0 : index
    %0 = vector.load %arg2[%c0, %c0_0, %c0_1] : memref<8x4x128xf32, #tpu.memory_space<vmem>>, vector<8x4x128xf32>
    %c0_2 = arith.constant 0 : index
    %c0_3 = arith.constant 0 : index
    %c0_4 = arith.constant 0 : index
    %1 = vector.load %arg3[%c0_2, %c0_3, %c0_4] : memref<8x1x128xf32, #tpu.memory_space<vmem>>, vector<8x1x128xf32>
    %2 = vector.broadcast %1 : vector<8x1x128xf32> to vector<8x4x128xf32>
    %3 = arith.addf %0, %2 : vector<8x4x128xf32>
    %c0_5 = arith.constant 0 : index
    %c0_6 = arith.constant 0 : index
    %c0_7 = arith.constant 0 : index
    %4 = vector.load %arg4[%c0_5, %c0_6, %c0_7] : memref<8x4x128xf32, #tpu.memory_space<vmem>>, vector<8x4x128xf32>
    tpu.vector_store %arg4[%c0_5, %c0_6, %c0_7], %3 {strides = array<i32>} : memref<8x4x128xf32, #tpu.memory_space<vmem>>, vector<8x4x128xf32>,
    return
  }
  func.func @transform_0(%arg0: i32, %arg1: i32) -> (i32, i32, i32) {
    %c0_i32 = arith.constant 0 : i32
    %c0_i32_0 = arith.constant 0 : i32
    return %arg0, %arg1, %c0_i32 : i32, i32, i32
  }
  func.func @transform_1(%arg0: i32, %arg1: i32) -> (i32, i32, i32) {
    %c0_i32 = arith.constant 0 : i32
    %c0_i32_0 = arith.constant 0 : i32
    %c0_i32_1 = arith.constant 0 : i32
    return %arg0, %c0_i32, %c0_i32_0 : i32, i32, i32
  }
  func.func @transform_2(%arg0: i32, %arg1: i32) -> (i32, i32, i32) {
    %c0_i32 = arith.constant 0 : i32
    %c0_i32_0 = arith.constant 0 : i32
    return %arg0, %arg1, %c0_i32 : i32, i32, i32
  }
}

</mosaic_0001>

<bundles_post_ra>
// kernel: tpu_custom_call.1
= control target key start
LH: loop header
LB: loop body
LE: loop exit
PB: predicated region body
PF: predicated region fallthrough
CT: control target
= control target key end

     0   :  { %7 = vsyncpa [#allocation3], 0  ;;  %s958_s0 = inlined_call_operand.hbm [shape: f32[16,4,128], index: 0, kind: input, shape index: {}]   ;;  %s959_s1 = inlined_call_operand.hbm [shape: f32[64,1,128], index: 1, kind: input, shape index: {}]   ;;  %s960_s2 = inlined_call_operand.hbm [shape: f32[16,4,128], index: 2, kind: output, shape index: {}]  }
   0x1   :  { %9 = vsyncpa [#allocation3 + $0x1], 0 }
   0x2   :  { %10 = vsyncpa [#allocation6], 0 }
   0x3   :  { %12 = vsyncpa [#allocation6 + $0x1], 0 }
   0x4   :  { %13 = vsyncpa [#allocation4], 0 }
   0x5   :  { %15 = vsyncpa [#allocation4 + $0x1], 0  ;;  %s700_s9 = smov 0   ;;  %s702_s10 = smov 0  }
   0x6   :  { %s704_s11 = smov 0   ;;  %s706_s12 = smov 0  }
   0x7   :  { %s708_s13 = smov 0   ;;  %s710_s14 = smov 0  }
   0x8 LB: > { %s425_s15 = sadd.s32 4294967295, %s674_s14   ;;  %s426_s16 = sadd.s32 4294967294, %s674_s14   ;;  %s674_s14 = sphi %s710_s14, %s21_s14   ;;  %s670_s13 = sphi %s708_s13, %s978_s13   ;;  %s666_s12 = sphi %s706_s12, %s977_s12   ;;  %s662_s11 = sphi %s704_s11, %s976_s11   ;;  %s658_s10 = sphi %s702_s10, %s975_s10   ;;  %s654_s9 = sphi %s700_s9, %s974_s9  }
   0x9   : > { %s33_s17 = sadd.s32 1, %s670_s13  ;;  %s42_s18 = sadd.s32 1, %s662_s11 }
   0xa   : > { %p35_p0 = scmp.ge.s32.totalorder %s33_s17, 2  ;;  %p49_p1 = scmp.ne.s32.totalorder %s662_s11, %s658_s10 }
   0xb   : > { %p50_p2 = scmp.eq.s32.totalorder %s674_s14, 0  ;;  %p55_p3 = scmp.ne.s32.totalorder %s658_s10, %s654_s9 }
   0xc   : > { %s980_s17 = smov (%p35_p0, %s33_s17), 0  ;;  %p56_p5 = scmp.eq.s32.totalorder %s425_s15, 0 }
   0xd   : > { %p741_p4 = por %p50_p2, %p49_p1  ;;  %s37_s20 = ssub.s32 %s670_s13, %s980_s17 }
   0xe   : > { %p107_p6 = scmp.eq.s32.totalorder %s425_s15, 1  ;;  %p40_p7 = scmp.eq.s32.totalorder %s37_s20, 0 }
   0xf   : > { %p747_p8 = por %p56_p5, %p55_p3  ;;  %p113_p10 = scmp.eq.s32.totalorder %s426_s16, 1 }
  0x10   : > { %p751_p9 = por %p107_p6, %p49_p1  ;;  %p472_p13 = scmp.lt.s32.totalorder %s674_s14, 2 }
  0x11   : > { %s964_s21 = scalar_select %p747_p8, 1, 0 }
  0x12   : > { %s965_s22 = scalar_select %p751_p9, 1, 0 }
  0x13   : > { %s756_s23 = scalar_select %p40_p7, %s662_s11, %s42_s18  }
  0x14   : > { %p758_p11 = por %p113_p10, %p55_p3  ;;  %s765_s25 = sand.u32 1, %s662_s11  }
  0x15   : > { %s429_s26 = sshll.u32 %s765_s25, 5  ;;  %s452_s27 = sshll.u32 %s670_s13, 9 }
  0x16   : > { %s966_s24 = scalar_select %p758_p11, 1, 0 }
  0x17   : > { %s772_s30 = scalar_lea.hbm %s958_s0, %s452_s27  ;;  %s137_s3 = scalar_lea.vmem [#allocation2], %s429_s26 }
  0x18   : > { %s145_s4 = sshll.u32 %s137_s3, 4  ;;  %p778_p0 = pnand %p472_p13, %p741_p4  ;;  %s774_s4 = int_to_ptr.vmem [resolvable:$true] %s145_s4 }
  0x19   : > { %s134_s6 = scalar_lea.sflag [#allocation3], %s765_s25  ;;  %s528_s7 = scalar_lea.hbm %s772_s30, 512 }
  0x1a   : > { %p529_p2 = scmp.ne.s32.totalorder %s772_s30, %s528_s7  ;;  %p530_p3 = pneg %p778_p0 }
  0x1b   : > { %s533_s16 = scalar_lea.hbm %s958_s0, 1024  ;;  %p534_p4 = scmp.lt.u32.totalorder %s772_s30, %s958_s0 }
  0x1c   : > { %p531_p5 = pnand %p530_p3, %p529_p2  ;;  %p535_p7 = scmp.lt.u32.totalorder %s533_s16, %s528_s7 }
  0x1d   : > { %p537_p13 = scmp.lt.u32.totalorder %s528_s7, %s772_s30 }
  0x1e   : > { %p532_p6 = pneg %p531_p5  ;;  %p536_p10 = por %p535_p7, %p534_p4 }
  0x20   : > { %p538_p12 = por %p537_p13, %p536_p10 }
  0x22   : > { %p539_p1 = pnand %p538_p12, %p532_p6 }
  0x24   : > { %542 = shalt.err (!%p539_p1)
}
  0x25   : > { %s543_s20 = scalar_lea.vmem %s774_s4, 512  ;;  %s676_s26 = smov [#allocation2]  }
  0x26   : > { %p544_p2 = scmp.ne.s32.totalorder %s774_s4, %s543_s20  ;;  %s548_s27 = sshll.u32 %s676_s26, 4  ;;  %s549_s27 = int_to_ptr.vmem [resolvable:$false] %s548_s27 }
  0x27   : > { %s550_s28 = scalar_lea.vmem %s549_s27, 1024  ;;  %p551_p9 = scmp.lt.s32.totalorder %s774_s4, %s549_s27 }
  0x28   : > { %p546_p5 = pnand %p544_p2, %p530_p3  ;;  %p552_p4 = scmp.lt.s32.totalorder %s550_s28, %s543_s20 }
  0x2a   : > { %p547_p11 = pneg %p546_p5  ;;  %p553_p7 = por %p552_p4, %p551_p9 }
  0x2c   : > { %p554_p10 = pnand %p553_p7, %p547_p11 }
  0x2e   : > { %557 = shalt.err (!%p554_p10)
}
  0x2f   : > { %s677_s29 = smov 64   ;;  %s678_s3 = smov 4  }
  0x30   : > { %464 = dma.hbm_to_vmem [thread:$0]  (!%p778_p0), %s772_s30, 512, %s774_s4, %s134_s6, %s677_s29, %s677_s29, %s678_s3  }
  0x31   : > { %p174_p12 = scmp.lt.s32.totalorder %s674_s14, 3  ;;  %s432_s7 = sshll.u32 %s765_s25, 3 }
  0x32   : > { %s453_s8 = sshll.u32 %s670_s13, 7  ;;  %p968_p9 = scmp.ge.s32.totalorder %s674_s14, 1 }
  0x33   : > { %s823_s19 = scalar_lea.hbm %s959_s1, %s453_s8  ;;  %s159_s20 = scalar_lea.vmem [#allocation5], %s432_s7 }
  0x34   : > { %p816_p11 = pnand %p968_p9, %p174_p12  ;;  %s166_s26 = sshll.u32 %s159_s20, 4  ;;  %s825_s26 = int_to_ptr.vmem [resolvable:$true] %s166_s26 }
  0x35   : > { %s156_s30 = scalar_lea.sflag [#allocation6], %s765_s25  ;;  %s558_s4 = scalar_lea.hbm %s823_s19, 128 }
  0x36   : > { %p559_p1 = scmp.ne.s32.totalorder %s823_s19, %s558_s4  ;;  %s563_s28 = scalar_lea.hbm %s959_s1, 1024 }
  0x37   : > { %p564_p2 = scmp.lt.u32.totalorder %s823_s19, %s959_s1  ;;  %p565_p5 = scmp.lt.u32.totalorder %s563_s28, %s558_s4 }
  0x38   : > { %p561_p6 = pnand %p559_p1, %p530_p3  ;;  %p567_p7 = scmp.lt.u32.totalorder %s558_s4, %s823_s19 }
  0x39   : > { %p566_p4 = por %p565_p5, %p564_p2 }
  0x3a   : > { %p562_p13 = pneg %p561_p6 }
  0x3b   : > { %p568_p10 = por %p567_p7, %p566_p4 }
  0x3d   : > { %p569_p12 = pnand %p568_p10, %p562_p13 }
  0x3f   : > { %572 = shalt.err (!%p569_p12)
}
  0x40   : > { %s573_s7 = scalar_lea.vmem %s825_s26, 128  ;;  %s679_s8 = smov [#allocation5]  }
  0x41   : > { %p574_p9 = scmp.ne.s32.totalorder %s825_s26, %s573_s7  ;;  %s578_s16 = sshll.u32 %s679_s8, 4  ;;  %s579_s16 = int_to_ptr.vmem [resolvable:$false] %s578_s16 }
  0x42   : > { %s580_s18 = scalar_lea.vmem %s579_s16, 256  ;;  %p581_p8 = scmp.lt.s32.totalorder %s825_s26, %s579_s16 }
  0x43   : > { %p576_p1 = pnand %p574_p9, %p530_p3  ;;  %p582_p2 = scmp.lt.s32.totalorder %s580_s18, %s573_s7 }
  0x45   : > { %p577_p6 = pneg %p576_p1  ;;  %p583_p5 = por %p582_p2, %p581_p8 }
  0x47   : > { %p584_p4 = pnand %p583_p5, %p577_p6 }
  0x49   : > { %587 = shalt.err (!%p584_p4)
}
  0x4a   : > { %s680_s20 = smov 16   ;;  %s681_s4 = smov 1  }
  0x4b   : > { %467 = dma.hbm_to_vmem [thread:$0]  (!%p778_p0), %s823_s19, 128, %s825_s26, %s156_s30, %s680_s20, %s680_s20, %s681_s4  }
  0x4c   : > { %178 = sbr.rel (%p816_p11) target bundleno = 119 (0x77), region = 28  ;;  %s856_s6 = sand.u32 (!%p816_p11), 1, %s658_s10  }
  0x4d   : > { %s436_s27 = sshll.u32 (!%p816_p11), %s856_s6, 5  ;;  %s181_s28 = scalar_lea.sflag (!%p816_p11), [#allocation3], %s856_s6 }
  0x4e   : > { %s860_s29 = scalar_lea.vmem (!%p816_p11), [#allocation2], %s436_s27  ;;  %p970_p8 = scmp.ne.s32.totalorder (!%p816_p11), %s964_s21, 0 }
  0x53   : > { %641 = dma.done.wait (%p970_p8), %s181_s28, 512  }
  0x54   : > { %643 = vsyncadd (%p970_p8), %s181_s28, 4294966784  ;;  %s437_s25 = sshll.u32 %s856_s6, 3  ;;  %s190_s5 = scalar_lea.sflag [#allocation6], %s856_s6 }
  0x55   : > { %s868_s15 = scalar_lea.vmem [#allocation5], %s437_s25 }
  0x56   : > { %645 = dma.done.wait (%p970_p8), %s190_s5, 128  }
  0x57   : > { %647 = vsyncadd (%p970_p8), %s190_s5, 4294967168  ;;  %s874_s19 = scalar_lea.vmem [#allocation7], %s436_s27  ;;  %s454_s30 = sshll.u32 %s666_s12, 9  ;;  %v222_v0 = vld [vmem:[%s860_s29] sm:$0xf] }
  0x58   : > { %s317_s26 = sshll.u32 %s874_s19, 4  ;;  %v439_v1 = vld [vmem:[%s868_s15] ss:$0 sm:$0xff]  ;;  %v223_v2 = vld [vmem:[%s860_s29 + $0x4] sm:$0xf]  ;;  %s905_s7 = scalar_lea.hbm %s960_s2, %s454_s30  ;;  %s896_s26 = int_to_ptr.vmem [resolvable:$true] %s317_s26 }
  0x59   : > { %v286_v3 = vadd.f32 %v439_v1, %v222_v0  ;;  %v440_v4 = vld [vmem:[%s868_s15 + $0x1] ss:$0 sm:$0xff]  ;;  %v441_v6 = vld [vmem:[%s868_s15 + $0x2] ss:$0 sm:$0xff]  ;;  %v225_v9 = vld [vmem:[%s860_s29 + $0xc] sm:$0xf] }
  0x5a   : > { %v224_v5 = vld [vmem:[%s860_s29 + $0x8] sm:$0xf]  ;;  %v287_v7 = vadd.f32 %v440_v4, %v223_v2  ;;  %v226_v11 = vld [vmem:[%s860_s29 + $0x10] sm:$0xf]  ;;  %v443_v13 = vld [vmem:[%s868_s15 + $0x4] ss:$0 sm:$0xff] }
  0x5b   : > { %v288_v8 = vadd.f32 %v441_v6, %v224_v5  ;;  %v442_v10 = vld [vmem:[%s868_s15 + $0x3] ss:$0 sm:$0xff]  ;;  %294 = vst [vmem:[%s874_s19] sm:$0xf] %v286_v3  ;;  %v227_v14 = vld [vmem:[%s860_s29 + $0x14] sm:$0xf]  ;;  %v290_v16 = vadd.f32 %v443_v13, %v226_v11  ;;  %s303_s8 = scalar_lea.sflag [#allocation4], %s856_s6 }
  0x5c   : > { %v289_v12 = vadd.f32 %v442_v10, %v225_v9  ;;  %v444_v15 = vld [vmem:[%s868_s15 + $0x5] ss:$0 sm:$0xff]  ;;  %295 = vst [vmem:[%s874_s19 + $0x4] sm:$0xf] %v287_v7  ;;  %v228_v18 = vld [vmem:[%s860_s29 + $0x18] sm:$0xf] }
  0x5d   : > { %296 = vst [vmem:[%s874_s19 + $0x8] sm:$0xf] %v288_v8  ;;  %v291_v17 = vadd.f32 %v444_v15, %v227_v14  ;;  %v445_v19 = vld [vmem:[%s868_s15 + $0x6] ss:$0 sm:$0xff]  ;;  %v229_v20 = vld [vmem:[%s860_s29 + $0x1c] sm:$0xf] }
  0x5e   : > { %297 = vst [vmem:[%s874_s19 + $0xc] sm:$0xf] %v289_v12  ;;  %v292_v21 = vadd.f32 %v445_v19, %v228_v18  ;;  %v446_v22 = vld [vmem:[%s868_s15 + $0x7] ss:$0 sm:$0xff]  ;;  %298 = vst [vmem:[%s874_s19 + $0x10] sm:$0xf] %v290_v16 }
  0x5f   : > { %299 = vst [vmem:[%s874_s19 + $0x14] sm:$0xf] %v291_v17  ;;  %v293_v23 = vadd.f32 %v446_v22, %v229_v20  ;;  %s588_s16 = scalar_lea.vmem %s896_s26, 512  ;;  %p971_p3 = scmp.ne.s32.totalorder %s965_s22, 0 }
  0x60   : > { %300 = vst [vmem:[%s874_s19 + $0x18] sm:$0xf] %v292_v21  ;;  %p589_p0 = scmp.ne.s32.totalorder %s896_s26, %s588_s16  ;;  %s682_s18 = smov [#allocation7]  }
  0x61   : > { %301 = vst [vmem:[%s874_s19 + $0x1c] sm:$0xf] %v293_v23  ;;  %s592_s20 = sshll.u32 %s682_s18, 4  ;;  %s593_s20 = int_to_ptr.vmem [resolvable:$false] %s592_s20 }
  0x62   : > { %p590_p11 = pnand %p589_p0, %p971_p3  ;;  %s594_s12 = scalar_lea.vmem %s593_s20, 1024 }
  0x63   : > { %p595_p7 = scmp.lt.s32.totalorder %s896_s26, %s593_s20  ;;  %p596_p10 = scmp.lt.s32.totalorder %s594_s12, %s588_s16 }
  0x64   : > { %p591_p13 = pneg %p590_p11 }
  0x65   : > { %p597_p12 = por %p596_p10, %p595_p7 }
  0x67   : > { %p598_p9 = pnand %p597_p12, %p591_p13 }
  0x69   : > { %601 = shalt.err (!%p598_p9)
}
  0x6a   : > { %s602_s4 = scalar_lea.hbm %s905_s7, 512  ;;  %s606_s29 = scalar_lea.hbm %s960_s2, 1024 }
  0x6b   : > { %p603_p1 = scmp.ne.s32.totalorder %s905_s7, %s602_s4  ;;  %p607_p5 = scmp.lt.u32.totalorder %s905_s7, %s960_s2 }
  0x6c   : > { %p608_p4 = scmp.lt.u32.totalorder %s606_s29, %s602_s4  ;;  %p610_p0 = scmp.lt.u32.totalorder %s602_s4, %s905_s7 }
  0x6d   : > { %p604_p6 = pnand %p603_p1, %p971_p3 }
  0x6e   : > { %p609_p8 = por %p608_p4, %p607_p5 }
  0x6f   : > { %p605_p2 = pneg %p604_p6 }
  0x70   : > { %p611_p11 = por %p610_p0, %p609_p8 }
  0x72   : > { %p612_p13 = pnand %p611_p11, %p605_p2 }
  0x74   : > { %615 = shalt.err (!%p612_p13)
}
  0x75   : > { %s683_s15 = smov 64   ;;  %s684_s19 = smov 4  }
  0x76   : > { %459 = dma.vmem_to_hbm [thread:$0]  (%p971_p3), %s896_s26, 512, %s905_s7, %s303_s8, %s683_s15, %s683_s15, %s684_s19  }
  0x77 PF: > { %s332_s30 = sand.u32 1, %s654_s9   ;;  %p972_p7 = scmp.ne.s32.totalorder %s966_s24, 0 }
  0x78   : > { %p973_p10 = scmp.ge.s32.totalorder %s674_s14, 2  ;;  %s333_s21 = scalar_lea.sflag [#allocation4], %s332_s30 }
  0x7a   : > { %p469_p12 = pnand %p973_p10, %p972_p7 }
  0x7c   : > { %649 = dma.done.wait (!%p469_p12), %s333_s21, 512  }
  0x7d   : > { %651 = vsyncadd (!%p469_p12), %s333_s21, 4294966784  ;;  %s21_s14 = sadd.s32 1, %s674_s14   ;;  %s974_s9 = smov %s658_s10 }
  0x7e   : > { %p18_p9 = scmp.ge.s32.totalorder %s21_s14, 4   ;;  %s975_s10 = smov %s662_s11 }
  0x7f   : > { %s976_s11 = smov %s756_s23  ;;  %s977_s12 = smov %s670_s13 }
  0x80   : > { %s978_s13 = smov %s980_s17  ;;  %20 = sbr.rel (!%p18_p9) target bundleno = 8 (0x8), region = 86 }
  0x87   :  { %338 = vsyncpa [#allocation3], 1 }
  0x88   :  { %340 = vsyncpa [#allocation3 + $0x1], 1 }
  0x89   :  { %341 = vsyncpa [#allocation6], 1 }
  0x8a   :  { %343 = vsyncpa [#allocation6 + $0x1], 1 }
  0x8b   :  { %344 = vsyncpa [#allocation4], 1 }
  0x8c   :  { %346 = vsyncpa [#allocation4 + $0x1], 1 }

</bundles_post_ra>
